<compile_context>
chip_gen: v5e
topology: v5e:2x2
jax: 0.10.0
libtpu: 0.0.40
codegen_flags: <defaults>
</compile_context>

<pallas_src>
import jax
import jax.numpy as jnp
from jax.experimental import pallas as pl
from jax.experimental.pallas import tpu as pltpu

K, STRIDE, PAD = 5, 2, 2
BN_EPS = 1e-5


# ---------------- fused Pallas kernel (batch on the lane axis) ----------------

def _make_fused_kernel(out_ch: int, l_out: int):
    def kernel(xp_ref, wc_ref, sb_ref, wfc_ref, bfc_ref, o_ref, h_ref):
        # xp_ref:  (L + 2*PAD, bt)        f32 VMEM  -- padded input, batch in lanes
        # wc_ref:  (out_ch, K)            f32 SMEM  -- conv taps (C_in == 1)
        # sb_ref:  (2, out_ch)            f32 SMEM  -- folded BN [scale; bias]
        # wfc_ref: (classes, out_ch*l_out) f32 VMEM -- fc_w as-is (PyTorch flatten order)
        # bfc_ref: (classes, 1)           f32 VMEM
        # o_ref:   (classes, bt)          f32 VMEM  -- lane-dense output
        # h_ref:   (out_ch*l_out, bt)     f32 VMEM scratch -- stacked activations
        #
        # Output position l, tap k reads padded index 2*l + k -> one strided sublane
        # load per tap, shared across all output channels.
        windows = [xp_ref[pl.ds(k, l_out, stride=2), :] for k in range(K)]

        for oc in range(out_ch):               # static unroll: full scheduler visibility
            h = windows[0] * wc_ref[oc, 0]
            for k in range(1, K):
                h = h + windows[k] * wc_ref[oc, k]
            # folded BatchNorm (eval) + ReLU, f32 epilogue (v5e-safe)
            h = jnp.maximum(h * sb_ref[0, oc] + sb_ref[1, oc], 0.0)   # (l_out, bt)
            h_ref[oc * l_out:(oc + 1) * l_out, :] = h                 # channel-major stack

        # Single FC matmul: (classes, out_ch*l_out) @ (out_ch*l_out, bt)
        o_ref[...] = (jnp.dot(wfc_ref[...], h_ref[...],
                              preferred_element_type=jnp.float32)
                      + bfc_ref[...]).astype(o_ref.dtype)
    return kernel


def fused_forward(xp, wc, sb, wfc, bfc, bt):
    l_pad, n_pad = xp.shape
    out_ch = wc.shape[0]
    classes, feat = wfc.shape
    l_out = feat // out_ch
    grid = (n_pad // bt,)

    kernel = _make_fused_kernel(out_ch, l_out)
    return pl.pallas_call(
        kernel,
        out_shape=jax.ShapeDtypeStruct((classes, n_pad), jnp.float32),
        grid=grid,
        in_specs=[
            # batch (lanes) is the tiled axis; length (sublanes) is resident in full
            pl.BlockSpec((l_pad, bt), lambda i: (0, i)),
            pl.BlockSpec(memory_space=pltpu.MemorySpace.SMEM),   # conv taps
            pl.BlockSpec(memory_space=pltpu.MemorySpace.SMEM),   # packed BN scale/bias
            pl.BlockSpec((classes, feat), lambda i: (0, 0)),     # index-invariant: stays resident
            pl.BlockSpec((classes, 1), lambda i: (0, 0)),
        ],
        out_specs=pl.BlockSpec((classes, bt), lambda i: (0, i)),
        scratch_shapes=[pltpu.VMEM((feat, bt), jnp.float32)],
        compiler_params=pltpu.CompilerParams(
            dimension_semantics=("parallel",)),
    )(xp, wc, sb, wfc, bfc)


# ---------------- one-time parameter preparation (hoisted off the hot path) ----------------

def prepare_params(params):
    conv_w = params["conv_w"]                               # (out_ch, C_in, K)
    assert conv_w.shape[1] == 1, "fused kernel implements in_ch == 1 (module default)"
    scale = params["bn_gamma"] / jnp.sqrt(params["bn_var"] + BN_EPS)
    bias = params["bn_beta"] + scale * (params["conv_b"] - params["bn_mean"])
    return {
        "wc": conv_w[:, 0, :],                              # (out_ch, K)   -> SMEM
        "sb": jnp.stack([scale, bias], axis=0),             # (2, out_ch)   -> SMEM
        "wfc": params["fc_w"],                              # (classes, out_ch*L_out)
        "bfc": params["fc_b"][:, None],                     # (classes, 1)
    }


# ---------------- model forward (glue = ONE fused transpose/pad copy) ----------------

@jax.jit
def simple_cnn_forward(x, prep):
    # x: (N, 1, L) — PyTorch NCL layout
    n = x.shape[0]
    # Tile selection: keep lanes dense (multiple of 128) and >= 2 grid steps at large N
    # so the "parallel" axis pipelines / shards across v7x TensorCores.  VMEM is never
    # the limiter at these block sizes on any generation.
    bt = 512 if n >= 1024 else 128
    n_pad = -(-n // bt) * bt
    # Single fused copy: NCL -> (L, N) batch-in-lanes transpose + conv zero-pad + batch pad.
    xp = jnp.pad(x[:, 0, :].T, ((PAD, PAD), (0, n_pad - n)))      # (L + 2*PAD, n_pad)
    out_t = fused_forward(xp, prep["wc"], prep["sb"], prep["wfc"], prep["bfc"], bt)
    return out_t[:, :n].T                                         # (N, classes)


# ---------------- reference (pure JAX, independent conv path) ----------------

def reference_forward(x, params):
    conv = jax.lax.conv_general_dilated(
        x, params["conv_w"], window_strides=(STRIDE,), padding=[(PAD, PAD)],
        dimension_numbers=("NCH", "OIH", "NCH"),
    ) + params["conv_b"][None, :, None]
    bn = (conv - params["bn_mean"][None, :, None]) / jnp.sqrt(
        params["bn_var"][None, :, None] + BN_EPS
    ) * params["bn_gamma"][None, :, None] + params["bn_beta"][None, :, None]
    h = jnp.maximum(bn, 0.0)
    h = h.reshape(h.shape[0], -1)
    return h @ params["fc_w"].T + params["fc_b"][None, :]


# ---------------- main ----------------

if __name__ == "__main__":
    # Small shapes consistent with the module: in_ch=1, out_ch=8, in_len=16, classes=4
    N, C_IN, OUT_CH, IN_LEN, CLASSES = 2, 1, 8, 16, 4
    L_OUT = IN_LEN // 2

    key = jax.random.PRNGKey(0)
    k = jax.random.split(key, 7)
    params = {
        "conv_w": 0.1 * jax.random.normal(k[0], (OUT_CH, C_IN, K), jnp.float32),
        "conv_b": 0.1 * jax.random.normal(k[1], (OUT_CH,), jnp.float32),
        "bn_gamma": 1.0 + 0.05 * jax.random.normal(k[2], (OUT_CH,), jnp.float32),
        "bn_beta": 0.05 * jax.random.normal(k[3], (OUT_CH,), jnp.float32),
        "bn_mean": 0.01 * jnp.arange(OUT_CH, dtype=jnp.float32),
        "bn_var": 1.0 + 0.1 * jnp.arange(OUT_CH, dtype=jnp.float32),
        "fc_w": 0.1 * jax.random.normal(k[4], (CLASSES, OUT_CH * L_OUT), jnp.float32),
        "fc_b": 0.1 * jax.random.normal(k[5], (CLASSES,), jnp.float32),
    }
    x = jax.random.normal(k[6], (N, C_IN, IN_LEN), jnp.float32)

    prep = prepare_params(params)        # one-time: BN fold (no weight transpose needed)
    out = simple_cnn_forward(x, prep)
    out = jax.block_until_ready(out)

    ref = reference_forward(x, params)
    assert out.shape == (N, CLASSES)
    assert jnp.allclose(out, ref, atol=1e-4, rtol=1e-4), "mismatch vs reference"

    print("KERNEL_OK")
</pallas_src>

<mosaic_0001>
module attributes {stable_mosaic.version = 11 : i64} {
  func.func @kernel(%arg0: i32, %arg1: memref<20x128xf32, #tpu.memory_space<vmem>>, %arg2: memref<8x5xf32, #tpu.memory_space<smem>>, %arg3: memref<2x8xf32, #tpu.memory_space<smem>>, %arg4: memref<4x64xf32, #tpu.memory_space<vmem>>, %arg5: memref<4x1xf32, #tpu.memory_space<vmem>>, %arg6: memref<4x128xf32, #tpu.memory_space<vmem>>, %arg7: memref<64x128xf32, #tpu.memory_space<vmem>>) attributes {dimension_semantics = [#tpu.dimension_semantics<parallel>], iteration_bounds = array<i64: 1>, scalar_prefetch = 0 : i64, scratch_operands = 1 : i64, tpu.core_type = #tpu.core_type<tc>, window_params = [{transform_indices = @transform_0, window_bounds = array<i64: 20, 128>}, {transform_indices = @transform_1, window_bounds = array<i64: 8, 5>}, {transform_indices = @transform_2, window_bounds = array<i64: 2, 8>}, {pipeline_mode = #tpu.pipeline_mode<synchronous>, transform_indices = @transform_3, window_bounds = array<i64: 4, 64>}, {pipeline_mode = #tpu.pipeline_mode<synchronous>, transform_indices = @transform_4, window_bounds = array<i64: 4, 1>}, {transform_indices = @transform_5, window_bounds = array<i64: 4, 128>}]} {
    %c0 = arith.constant 0 : index
    %c0_0 = arith.constant 0 : index
    %0 = tpu.strided_load %arg1[%c0, %c0_0] {strides = array<i32: 2, 1>} : memref<20x128xf32, #tpu.memory_space<vmem>>, vector<8x128xf32>
    %c1 = arith.constant 1 : index
    %c0_1 = arith.constant 0 : index
    %1 = tpu.strided_load %arg1[%c1, %c0_1] {strides = array<i32: 2, 1>} : memref<20x128xf32, #tpu.memory_space<vmem>>, vector<8x128xf32>
    %c2 = arith.constant 2 : index
    %c0_2 = arith.constant 0 : index
    %2 = tpu.strided_load %arg1[%c2, %c0_2] {strides = array<i32: 2, 1>} : memref<20x128xf32, #tpu.memory_space<vmem>>, vector<8x128xf32>
    %c3 = arith.constant 3 : index
    %c0_3 = arith.constant 0 : index
    %3 = tpu.strided_load %arg1[%c3, %c0_3] {strides = array<i32: 2, 1>} : memref<20x128xf32, #tpu.memory_space<vmem>>, vector<8x128xf32>
    %c4 = arith.constant 4 : index
    %c0_4 = arith.constant 0 : index
    %4 = tpu.strided_load %arg1[%c4, %c0_4] {strides = array<i32: 2, 1>} : memref<20x128xf32, #tpu.memory_space<vmem>>, vector<8x128xf32>
    %c0_5 = arith.constant 0 : index
    %c0_6 = arith.constant 0 : index
    %5 = memref.load %arg2[%c0_5, %c0_6] : memref<8x5xf32, #tpu.memory_space<smem>>
    %6 = vector.broadcast %5 : f32 to vector<8x128xf32>
    %7 = arith.mulf %0, %6 : vector<8x128xf32>
    %c0_7 = arith.constant 0 : index
    %c1_8 = arith.constant 1 : index
    %8 = memref.load %arg2[%c0_7, %c1_8] : memref<8x5xf32, #tpu.memory_space<smem>>
    %9 = vector.broadcast %8 : f32 to vector<8x128xf32>
    %10 = arith.mulf %1, %9 : vector<8x128xf32>
    %11 = arith.addf %7, %10 : vector<8x128xf32>
    %c0_9 = arith.constant 0 : index
    %c2_10 = arith.constant 2 : index
    %12 = memref.load %arg2[%c0_9, %c2_10] : memref<8x5xf32, #tpu.memory_space<smem>>
    %13 = vector.broadcast %12 : f32 to vector<8x128xf32>
    %14 = arith.mulf %2, %13 : vector<8x128xf32>
    %15 = arith.addf %11, %14 : vector<8x128xf32>
    %c0_11 = arith.constant 0 : index
    %c3_12 = arith.constant 3 : index
    %16 = memref.load %arg2[%c0_11, %c3_12] : memref<8x5xf32, #tpu.memory_space<smem>>
    %17 = vector.broadcast %16 : f32 to vector<8x128xf32>
    %18 = arith.mulf %3, %17 : vector<8x128xf32>
    %19 = arith.addf %15, %18 : vector<8x128xf32>
    %c0_13 = arith.constant 0 : index
    %c4_14 = arith.constant 4 : index
    %20 = memref.load %arg2[%c0_13, %c4_14] : memref<8x5xf32, #tpu.memory_space<smem>>
    %21 = vector.broadcast %20 : f32 to vector<8x128xf32>
    %22 = arith.mulf %4, %21 : vector<8x128xf32>
    %23 = arith.addf %19, %22 : vector<8x128xf32>
    %c0_15 = arith.constant 0 : index
    %c0_16 = arith.constant 0 : index
    %24 = memref.load %arg3[%c0_15, %c0_16] : memref<2x8xf32, #tpu.memory_space<smem>>
    %25 = vector.broadcast %24 : f32 to vector<8x128xf32>
    %26 = arith.mulf %23, %25 : vector<8x128xf32>
    %c1_17 = arith.constant 1 : index
    %c0_18 = arith.constant 0 : index
    %27 = memref.load %arg3[%c1_17, %c0_18] : memref<2x8xf32, #tpu.memory_space<smem>>
    %28 = vector.broadcast %27 : f32 to vector<8x128xf32>
    %29 = arith.addf %26, %28 : vector<8x128xf32>
    %cst = arith.constant 0.000000e+00 : f32
    %30 = vector.broadcast %cst : f32 to vector<8x128xf32>
    %31 = arith.maximumf %29, %30 : vector<8x128xf32>
    %c0_19 = arith.constant 0 : index
    %c0_20 = arith.constant 0 : index
    %32 = vector.load %arg7[%c0_19, %c0_20] : memref<64x128xf32, #tpu.memory_space<vmem>>, vector<8x128xf32>
    tpu.vector_store %arg7[%c0_19, %c0_20], %31 {strides = array<i32>} : memref<64x128xf32, #tpu.memory_space<vmem>>, vector<8x128xf32>,
    %c1_21 = arith.constant 1 : index
    %c0_22 = arith.constant 0 : index
    %33 = memref.load %arg2[%c1_21, %c0_22] : memref<8x5xf32, #tpu.memory_space<smem>>
    %34 = vector.broadcast %33 : f32 to vector<8x128xf32>
    %35 = arith.mulf %0, %34 : vector<8x128xf32>
    %c1_23 = arith.constant 1 : index
    %c1_24 = arith.constant 1 : index
    %36 = memref.load %arg2[%c1_23, %c1_24] : memref<8x5xf32, #tpu.memory_space<smem>>
    %37 = vector.broadcast %36 : f32 to vector<8x128xf32>
    %38 = arith.mulf %1, %37 : vector<8x128xf32>
    %39 = arith.addf %35, %38 : vector<8x128xf32>
    %c1_25 = arith.constant 1 : index
    %c2_26 = arith.constant 2 : index
    %40 = memref.load %arg2[%c1_25, %c2_26] : memref<8x5xf32, #tpu.memory_space<smem>>
    %41 = vector.broadcast %40 : f32 to vector<8x128xf32>
    %42 = arith.mulf %2, %41 : vector<8x128xf32>
    %43 = arith.addf %39, %42 : vector<8x128xf32>
    %c1_27 = arith.constant 1 : index
    %c3_28 = arith.constant 3 : index
    %44 = memref.load %arg2[%c1_27, %c3_28] : memref<8x5xf32, #tpu.memory_space<smem>>
    %45 = vector.broadcast %44 : f32 to vector<8x128xf32>
    %46 = arith.mulf %3, %45 : vector<8x128xf32>
    %47 = arith.addf %43, %46 : vector<8x128xf32>
    %c1_29 = arith.constant 1 : index
    %c4_30 = arith.constant 4 : index
    %48 = memref.load %arg2[%c1_29, %c4_30] : memref<8x5xf32, #tpu.memory_space<smem>>
    %49 = vector.broadcast %48 : f32 to vector<8x128xf32>
    %50 = arith.mulf %4, %49 : vector<8x128xf32>
    %51 = arith.addf %47, %50 : vector<8x128xf32>
    %c0_31 = arith.constant 0 : index
    %c1_32 = arith.constant 1 : index
    %52 = memref.load %arg3[%c0_31, %c1_32] : memref<2x8xf32, #tpu.memory_space<smem>>
    %53 = vector.broadcast %52 : f32 to vector<8x128xf32>
    %54 = arith.mulf %51, %53 : vector<8x128xf32>
    %c1_33 = arith.constant 1 : index
    %c1_34 = arith.constant 1 : index
    %55 = memref.load %arg3[%c1_33, %c1_34] : memref<2x8xf32, #tpu.memory_space<smem>>
    %56 = vector.broadcast %55 : f32 to vector<8x128xf32>
    %57 = arith.addf %54, %56 : vector<8x128xf32>
    %cst_35 = arith.constant 0.000000e+00 : f32
    %58 = vector.broadcast %cst_35 : f32 to vector<8x128xf32>
    %59 = arith.maximumf %57, %58 : vector<8x128xf32>
    %c8 = arith.constant 8 : index
    %c0_36 = arith.constant 0 : index
    %60 = vector.load %arg7[%c8, %c0_36] : memref<64x128xf32, #tpu.memory_space<vmem>>, vector<8x128xf32>
    tpu.vector_store %arg7[%c8, %c0_36], %59 {strides = array<i32>} : memref<64x128xf32, #tpu.memory_space<vmem>>, vector<8x128xf32>,
    %c2_37 = arith.constant 2 : index
    %c0_38 = arith.constant 0 : index
    %61 = memref.load %arg2[%c2_37, %c0_38] : memref<8x5xf32, #tpu.memory_space<smem>>
    %62 = vector.broadcast %61 : f32 to vector<8x128xf32>
    %63 = arith.mulf %0, %62 : vector<8x128xf32>
    %c2_39 = arith.constant 2 : index
    %c1_40 = arith.constant 1 : index
    %64 = memref.load %arg2[%c2_39, %c1_40] : memref<8x5xf32, #tpu.memory_space<smem>>
    %65 = vector.broadcast %64 : f32 to vector<8x128xf32>
    %66 = arith.mulf %1, %65 : vector<8x128xf32>
    %67 = arith.addf %63, %66 : vector<8x128xf32>
    %c2_41 = arith.constant 2 : index
    %c2_42 = arith.constant 2 : index
    %68 = memref.load %arg2[%c2_41, %c2_42] : memref<8x5xf32, #tpu.memory_space<smem>>
    %69 = vector.broadcast %68 : f32 to vector<8x128xf32>
    %70 = arith.mulf %2, %69 : vector<8x128xf32>
    %71 = arith.addf %67, %70 : vector<8x128xf32>
    %c2_43 = arith.constant 2 : index
    %c3_44 = arith.constant 3 : index
    %72 = memref.load %arg2[%c2_43, %c3_44] : memref<8x5xf32, #tpu.memory_space<smem>>
    %73 = vector.broadcast %72 : f32 to vector<8x128xf32>
    %74 = arith.mulf %3, %73 : vector<8x128xf32>
    %75 = arith.addf %71, %74 : vector<8x128xf32>
    %c2_45 = arith.constant 2 : index
    %c4_46 = arith.constant 4 : index
    %76 = memref.load %arg2[%c2_45, %c4_46] : memref<8x5xf32, #tpu.memory_space<smem>>
    %77 = vector.broadcast %76 : f32 to vector<8x128xf32>
    %78 = arith.mulf %4, %77 : vector<8x128xf32>
    %79 = arith.addf %75, %78 : vector<8x128xf32>
    %c0_47 = arith.constant 0 : index
    %c2_48 = arith.constant 2 : index
    %80 = memref.load %arg3[%c0_47, %c2_48] : memref<2x8xf32, #tpu.memory_space<smem>>
    %81 = vector.broadcast %80 : f32 to vector<8x128xf32>
    %82 = arith.mulf %79, %81 : vector<8x128xf32>
    %c1_49 = arith.constant 1 : index
    %c2_50 = arith.constant 2 : index
    %83 = memref.load %arg3[%c1_49, %c2_50] : memref<2x8xf32, #tpu.memory_space<smem>>
    %84 = vector.broadcast %83 : f32 to vector<8x128xf32>
    %85 = arith.addf %82, %84 : vector<8x128xf32>
    %cst_51 = arith.constant 0.000000e+00 : f32
    %86 = vector.broadcast %cst_51 : f32 to vector<8x128xf32>
    %87 = arith.maximumf %85, %86 : vector<8x128xf32>
    %c16 = arith.constant 16 : index
    %c0_52 = arith.constant 0 : index
    %88 = vector.load %arg7[%c16, %c0_52] : memref<64x128xf32, #tpu.memory_space<vmem>>, vector<8x128xf32>
    tpu.vector_store %arg7[%c16, %c0_52], %87 {strides = array<i32>} : memref<64x128xf32, #tpu.memory_space<vmem>>, vector<8x128xf32>,
    %c3_53 = arith.constant 3 : index
    %c0_54 = arith.constant 0 : index
    %89 = memref.load %arg2[%c3_53, %c0_54] : memref<8x5xf32, #tpu.memory_space<smem>>
    %90 = vector.broadcast %89 : f32 to vector<8x128xf32>
    %91 = arith.mulf %0, %90 : vector<8x128xf32>
    %c3_55 = arith.constant 3 : index
    %c1_56 = arith.constant 1 : index
    %92 = memref.load %arg2[%c3_55, %c1_56] : memref<8x5xf32, #tpu.memory_space<smem>>
    %93 = vector.broadcast %92 : f32 to vector<8x128xf32>
    %94 = arith.mulf %1, %93 : vector<8x128xf32>
    %95 = arith.addf %91, %94 : vector<8x128xf32>
    %c3_57 = arith.constant 3 : index
    %c2_58 = arith.constant 2 : index
    %96 = memref.load %arg2[%c3_57, %c2_58] : memref<8x5xf32, #tpu.memory_space<smem>>
    %97 = vector.broadcast %96 : f32 to vector<8x128xf32>
    %98 = arith.mulf %2, %97 : vector<8x128xf32>
    %99 = arith.addf %95, %98 : vector<8x128xf32>
    %c3_59 = arith.constant 3 : index
    %c3_60 = arith.constant 3 : index
    %100 = memref.load %arg2[%c3_59, %c3_60] : memref<8x5xf32, #tpu.memory_space<smem>>
    %101 = vector.broadcast %100 : f32 to vector<8x128xf32>
    %102 = arith.mulf %3, %101 : vector<8x128xf32>
    %103 = arith.addf %99, %102 : vector<8x128xf32>
    %c3_61 = arith.constant 3 : index
    %c4_62 = arith.constant 4 : index
    %104 = memref.load %arg2[%c3_61, %c4_62] : memref<8x5xf32, #tpu.memory_space<smem>>
    %105 = vector.broadcast %104 : f32 to vector<8x128xf32>
    %106 = arith.mulf %4, %105 : vector<8x128xf32>
    %107 = arith.addf %103, %106 : vector<8x128xf32>
    %c0_63 = arith.constant 0 : index
    %c3_64 = arith.constant 3 : index
    %108 = memref.load %arg3[%c0_63, %c3_64] : memref<2x8xf32, #tpu.memory_space<smem>>
    %109 = vector.broadcast %108 : f32 to vector<8x128xf32>
    %110 = arith.mulf %107, %109 : vector<8x128xf32>
    %c1_65 = arith.constant 1 : index
    %c3_66 = arith.constant 3 : index
    %111 = memref.load %arg3[%c1_65, %c3_66] : memref<2x8xf32, #tpu.memory_space<smem>>
    %112 = vector.broadcast %111 : f32 to vector<8x128xf32>
    %113 = arith.addf %110, %112 : vector<8x128xf32>
    %cst_67 = arith.constant 0.000000e+00 : f32
    %114 = vector.broadcast %cst_67 : f32 to vector<8x128xf32>
    %115 = arith.maximumf %113, %114 : vector<8x128xf32>
    %c24 = arith.constant 24 : index
    %c0_68 = arith.constant 0 : index
    %116 = vector.load %arg7[%c24, %c0_68] : memref<64x128xf32, #tpu.memory_space<vmem>>, vector<8x128xf32>
    tpu.vector_store %arg7[%c24, %c0_68], %115 {strides = array<i32>} : memref<64x128xf32, #tpu.memory_space<vmem>>, vector<8x128xf32>,
    %c4_69 = arith.constant 4 : index
    %c0_70 = arith.constant 0 : index
    %117 = memref.load %arg2[%c4_69, %c0_70] : memref<8x5xf32, #tpu.memory_space<smem>>
    %118 = vector.broadcast %117 : f32 to vector<8x128xf32>
    %119 = arith.mulf %0, %118 : vector<8x128xf32>
    %c4_71 = arith.constant 4 : index
    %c1_72 = arith.constant 1 : index
    %120 = memref.load %arg2[%c4_71, %c1_72] : memref<8x5xf32, #tpu.memory_space<smem>>
    %121 = vector.broadcast %120 : f32 to vector<8x128xf32>
    %122 = arith.mulf %1, %121 : vector<8x128xf32>
    %123 = arith.addf %119, %122 : vector<8x128xf32>
    %c4_73 = arith.constant 4 : index
    %c2_74 = arith.constant 2 : index
    %124 = memref.load %arg2[%c4_73, %c2_74] : memref<8x5xf32, #tpu.memory_space<smem>>
    %125 = vector.broadcast %124 : f32 to vector<8x128xf32>
    %126 = arith.mulf %2, %125 : vector<8x128xf32>
    %127 = arith.addf %123, %126 : vector<8x128xf32>
    %c4_75 = arith.constant 4 : index
    %c3_76 = arith.constant 3 : index
    %128 = memref.load %arg2[%c4_75, %c3_76] : memref<8x5xf32, #tpu.memory_space<smem>>
    %129 = vector.broadcast %128 : f32 to vector<8x128xf32>
    %130 = arith.mulf %3, %129 : vector<8x128xf32>
    %131 = arith.addf %127, %130 : vector<8x128xf32>
    %c4_77 = arith.constant 4 : index
    %c4_78 = arith.constant 4 : index
    %132 = memref.load %arg2[%c4_77, %c4_78] : memref<8x5xf32, #tpu.memory_space<smem>>
    %133 = vector.broadcast %132 : f32 to vector<8x128xf32>
    %134 = arith.mulf %4, %133 : vector<8x128xf32>
    %135 = arith.addf %131, %134 : vector<8x128xf32>
    %c0_79 = arith.constant 0 : index
    %c4_80 = arith.constant 4 : index
    %136 = memref.load %arg3[%c0_79, %c4_80] : memref<2x8xf32, #tpu.memory_space<smem>>
    %137 = vector.broadcast %136 : f32 to vector<8x128xf32>
    %138 = arith.mulf %135, %137 : vector<8x128xf32>
    %c1_81 = arith.constant 1 : index
    %c4_82 = arith.constant 4 : index
    %139 = memref.load %arg3[%c1_81, %c4_82] : memref<2x8xf32, #tpu.memory_space<smem>>
    %140 = vector.broadcast %139 : f32 to vector<8x128xf32>
    %141 = arith.addf %138, %140 : vector<8x128xf32>
    %cst_83 = arith.constant 0.000000e+00 : f32
    %142 = vector.broadcast %cst_83 : f32 to vector<8x128xf32>
    %143 = arith.maximumf %141, %142 : vector<8x128xf32>
    %c32 = arith.constant 32 : index
    %c0_84 = arith.constant 0 : index
    %144 = vector.load %arg7[%c32, %c0_84] : memref<64x128xf32, #tpu.memory_space<vmem>>, vector<8x128xf32>
    tpu.vector_store %arg7[%c32, %c0_84], %143 {strides = array<i32>} : memref<64x128xf32, #tpu.memory_space<vmem>>, vector<8x128xf32>,
    %c5 = arith.constant 5 : index
    %c0_85 = arith.constant 0 : index
    %145 = memref.load %arg2[%c5, %c0_85] : memref<8x5xf32, #tpu.memory_space<smem>>
    %146 = vector.broadcast %145 : f32 to vector<8x128xf32>
    %147 = arith.mulf %0, %146 : vector<8x128xf32>
    %c5_86 = arith.constant 5 : index
    %c1_87 = arith.constant 1 : index
    %148 = memref.load %arg2[%c5_86, %c1_87] : memref<8x5xf32, #tpu.memory_space<smem>>
    %149 = vector.broadcast %148 : f32 to vector<8x128xf32>
    %150 = arith.mulf %1, %149 : vector<8x128xf32>
    %151 = arith.addf %147, %150 : vector<8x128xf32>
    %c5_88 = arith.constant 5 : index
    %c2_89 = arith.constant 2 : index
    %152 = memref.load %arg2[%c5_88, %c2_89] : memref<8x5xf32, #tpu.memory_space<smem>>
    %153 = vector.broadcast %152 : f32 to vector<8x128xf32>
    %154 = arith.mulf %2, %153 : vector<8x128xf32>
    %155 = arith.addf %151, %154 : vector<8x128xf32>
    %c5_90 = arith.constant 5 : index
    %c3_91 = arith.constant 3 : index
    %156 = memref.load %arg2[%c5_90, %c3_91] : memref<8x5xf32, #tpu.memory_space<smem>>
    %157 = vector.broadcast %156 : f32 to vector<8x128xf32>
    %158 = arith.mulf %3, %157 : vector<8x128xf32>
    %159 = arith.addf %155, %158 : vector<8x128xf32>
    %c5_92 = arith.constant 5 : index
    %c4_93 = arith.constant 4 : index
    %160 = memref.load %arg2[%c5_92, %c4_93] : memref<8x5xf32, #tpu.memory_space<smem>>
    %161 = vector.broadcast %160 : f32 to vector<8x128xf32>
    %162 = arith.mulf %4, %161 : vector<8x128xf32>
    %163 = arith.addf %159, %162 : vector<8x128xf32>
    %c0_94 = arith.constant 0 : index
    %c5_95 = arith.constant 5 : index
    %164 = memref.load %arg3[%c0_94, %c5_95] : memref<2x8xf32, #tpu.memory_space<smem>>
    %165 = vector.broadcast %164 : f32 to vector<8x128xf32>
    %166 = arith.mulf %163, %165 : vector<8x128xf32>
    %c1_96 = arith.constant 1 : index
    %c5_97 = arith.constant 5 : index
    %167 = memref.load %arg3[%c1_96, %c5_97] : memref<2x8xf32, #tpu.memory_space<smem>>
    %168 = vector.broadcast %167 : f32 to vector<8x128xf32>
    %169 = arith.addf %166, %168 : vector<8x128xf32>
    %cst_98 = arith.constant 0.000000e+00 : f32
    %170 = vector.broadcast %cst_98 : f32 to vector<8x128xf32>
    %171 = arith.maximumf %169, %170 : vector<8x128xf32>
    %c40 = arith.constant 40 : index
    %c0_99 = arith.constant 0 : index
    %172 = vector.load %arg7[%c40, %c0_99] : memref<64x128xf32, #tpu.memory_space<vmem>>, vector<8x128xf32>
    tpu.vector_store %arg7[%c40, %c0_99], %171 {strides = array<i32>} : memref<64x128xf32, #tpu.memory_space<vmem>>, vector<8x128xf32>,
    %c6 = arith.constant 6 : index
    %c0_100 = arith.constant 0 : index
    %173 = memref.load %arg2[%c6, %c0_100] : memref<8x5xf32, #tpu.memory_space<smem>>
    %174 = vector.broadcast %173 : f32 to vector<8x128xf32>
    %175 = arith.mulf %0, %174 : vector<8x128xf32>
    %c6_101 = arith.constant 6 : index
    %c1_102 = arith.constant 1 : index
    %176 = memref.load %arg2[%c6_101, %c1_102] : memref<8x5xf32, #tpu.memory_space<smem>>
    %177 = vector.broadcast %176 : f32 to vector<8x128xf32>
    %178 = arith.mulf %1, %177 : vector<8x128xf32>
    %179 = arith.addf %175, %178 : vector<8x128xf32>
    %c6_103 = arith.constant 6 : index
    %c2_104 = arith.constant 2 : index
    %180 = memref.load %arg2[%c6_103, %c2_104] : memref<8x5xf32, #tpu.memory_space<smem>>
    %181 = vector.broadcast %180 : f32 to vector<8x128xf32>
    %182 = arith.mulf %2, %181 : vector<8x128xf32>
    %183 = arith.addf %179, %182 : vector<8x128xf32>
    %c6_105 = arith.constant 6 : index
    %c3_106 = arith.constant 3 : index
    %184 = memref.load %arg2[%c6_105, %c3_106] : memref<8x5xf32, #tpu.memory_space<smem>>
    %185 = vector.broadcast %184 : f32 to vector<8x128xf32>
    %186 = arith.mulf %3, %185 : vector<8x128xf32>
    %187 = arith.addf %183, %186 : vector<8x128xf32>
    %c6_107 = arith.constant 6 : index
    %c4_108 = arith.constant 4 : index
    %188 = memref.load %arg2[%c6_107, %c4_108] : memref<8x5xf32, #tpu.memory_space<smem>>
    %189 = vector.broadcast %188 : f32 to vector<8x128xf32>
    %190 = arith.mulf %4, %189 : vector<8x128xf32>
    %191 = arith.addf %187, %190 : vector<8x128xf32>
    %c0_109 = arith.constant 0 : index
    %c6_110 = arith.constant 6 : index
    %192 = memref.load %arg3[%c0_109, %c6_110] : memref<2x8xf32, #tpu.memory_space<smem>>
    %193 = vector.broadcast %192 : f32 to vector<8x128xf32>
    %194 = arith.mulf %191, %193 : vector<8x128xf32>
    %c1_111 = arith.constant 1 : index
    %c6_112 = arith.constant 6 : index
    %195 = memref.load %arg3[%c1_111, %c6_112] : memref<2x8xf32, #tpu.memory_space<smem>>
    %196 = vector.broadcast %195 : f32 to vector<8x128xf32>
    %197 = arith.addf %194, %196 : vector<8x128xf32>
    %cst_113 = arith.constant 0.000000e+00 : f32
    %198 = vector.broadcast %cst_113 : f32 to vector<8x128xf32>
    %199 = arith.maximumf %197, %198 : vector<8x128xf32>
    %c48 = arith.constant 48 : index
    %c0_114 = arith.constant 0 : index
    %200 = vector.load %arg7[%c48, %c0_114] : memref<64x128xf32, #tpu.memory_space<vmem>>, vector<8x128xf32>
    tpu.vector_store %arg7[%c48, %c0_114], %199 {strides = array<i32>} : memref<64x128xf32, #tpu.memory_space<vmem>>, vector<8x128xf32>,
    %c7 = arith.constant 7 : index
    %c0_115 = arith.constant 0 : index
    %201 = memref.load %arg2[%c7, %c0_115] : memref<8x5xf32, #tpu.memory_space<smem>>
    %202 = vector.broadcast %201 : f32 to vector<8x128xf32>
    %203 = arith.mulf %0, %202 : vector<8x128xf32>
    %c7_116 = arith.constant 7 : index
    %c1_117 = arith.constant 1 : index
    %204 = memref.load %arg2[%c7_116, %c1_117] : memref<8x5xf32, #tpu.memory_space<smem>>
    %205 = vector.broadcast %204 : f32 to vector<8x128xf32>
    %206 = arith.mulf %1, %205 : vector<8x128xf32>
    %207 = arith.addf %203, %206 : vector<8x128xf32>
    %c7_118 = arith.constant 7 : index
    %c2_119 = arith.constant 2 : index
    %208 = memref.load %arg2[%c7_118, %c2_119] : memref<8x5xf32, #tpu.memory_space<smem>>
    %209 = vector.broadcast %208 : f32 to vector<8x128xf32>
    %210 = arith.mulf %2, %209 : vector<8x128xf32>
    %211 = arith.addf %207, %210 : vector<8x128xf32>
    %c7_120 = arith.constant 7 : index
    %c3_121 = arith.constant 3 : index
    %212 = memref.load %arg2[%c7_120, %c3_121] : memref<8x5xf32, #tpu.memory_space<smem>>
    %213 = vector.broadcast %212 : f32 to vector<8x128xf32>
    %214 = arith.mulf %3, %213 : vector<8x128xf32>
    %215 = arith.addf %211, %214 : vector<8x128xf32>
    %c7_122 = arith.constant 7 : index
    %c4_123 = arith.constant 4 : index
    %216 = memref.load %arg2[%c7_122, %c4_123] : memref<8x5xf32, #tpu.memory_space<smem>>
    %217 = vector.broadcast %216 : f32 to vector<8x128xf32>
    %218 = arith.mulf %4, %217 : vector<8x128xf32>
    %219 = arith.addf %215, %218 : vector<8x128xf32>
    %c0_124 = arith.constant 0 : index
    %c7_125 = arith.constant 7 : index
    %220 = memref.load %arg3[%c0_124, %c7_125] : memref<2x8xf32, #tpu.memory_space<smem>>
    %221 = vector.broadcast %220 : f32 to vector<8x128xf32>
    %222 = arith.mulf %219, %221 : vector<8x128xf32>
    %c1_126 = arith.constant 1 : index
    %c7_127 = arith.constant 7 : index
    %223 = memref.load %arg3[%c1_126, %c7_127] : memref<2x8xf32, #tpu.memory_space<smem>>
    %224 = vector.broadcast %223 : f32 to vector<8x128xf32>
    %225 = arith.addf %222, %224 : vector<8x128xf32>
    %cst_128 = arith.constant 0.000000e+00 : f32
    %226 = vector.broadcast %cst_128 : f32 to vector<8x128xf32>
    %227 = arith.maximumf %225, %226 : vector<8x128xf32>
    %c56 = arith.constant 56 : index
    %c0_129 = arith.constant 0 : index
    %228 = vector.load %arg7[%c56, %c0_129] : memref<64x128xf32, #tpu.memory_space<vmem>>, vector<8x128xf32>
    tpu.vector_store %arg7[%c56, %c0_129], %227 {strides = array<i32>} : memref<64x128xf32, #tpu.memory_space<vmem>>, vector<8x128xf32>,
    %c0_130 = arith.constant 0 : index
    %c0_131 = arith.constant 0 : index
    %229 = vector.load %arg4[%c0_130, %c0_131] : memref<4x64xf32, #tpu.memory_space<vmem>>, vector<4x64xf32>
    %c0_132 = arith.constant 0 : index
    %c0_133 = arith.constant 0 : index
    %230 = vector.load %arg7[%c0_132, %c0_133] : memref<64x128xf32, #tpu.memory_space<vmem>>, vector<64x128xf32>
    %cst_134 = arith.constant dense<0.000000e+00> : vector<4x128xf32>
    %231 = tpu.matmul %229, %230, %cst_134 {dimension_numbers = #tpu.dot_dimension_numbers<[1], [0], [0], [1], [0, 0, 1, 1], [], []>} : vector<4x64xf32>, vector<64x128xf32>, vector<4x128xf32> -> vector<4x128xf32>
    %c0_135 = arith.constant 0 : index
    %c0_136 = arith.constant 0 : index
    %232 = vector.load %arg5[%c0_135, %c0_136] : memref<4x1xf32, #tpu.memory_space<vmem>>, vector<4x1xf32>
    %233 = vector.broadcast %232 : vector<4x1xf32> to vector<4x128xf32>
    %234 = arith.addf %231, %233 : vector<4x128xf32>
    %c0_137 = arith.constant 0 : index
    %c0_138 = arith.constant 0 : index
    %235 = vector.load %arg6[%c0_137, %c0_138] : memref<4x128xf32, #tpu.memory_space<vmem>>, vector<4x128xf32>
    tpu.vector_store %arg6[%c0_137, %c0_138], %234 {strides = array<i32>} : memref<4x128xf32, #tpu.memory_space<vmem>>, vector<4x128xf32>,
    return
  }
  func.func @transform_0(%arg0: i32) -> (i32, i32) {
    %c0_i32 = arith.constant 0 : i32
    %c0_i32_0 = arith.constant 0 : i32
    return %c0_i32, %arg0 : i32, i32
  }
  func.func @transform_1(%arg0: i32) -> (i32, i32) {
    %c0_i32 = arith.constant 0 : i32
    %c0_i32_0 = arith.constant 0 : i32
    %c0_i32_1 = arith.constant 0 : i32
    return %c0_i32, %c0_i32_0 : i32, i32
  }
  func.func @transform_2(%arg0: i32) -> (i32, i32) {
    %c0_i32 = arith.constant 0 : i32
    %c0_i32_0 = arith.constant 0 : i32
    %c0_i32_1 = arith.constant 0 : i32
    return %c0_i32, %c0_i32_0 : i32, i32
  }
  func.func @transform_3(%arg0: i32) -> (i32, i32) {
    %c0_i32 = arith.constant 0 : i32
    %c0_i32_0 = arith.constant 0 : i32
    %c0_i32_1 = arith.constant 0 : i32
    return %c0_i32, %c0_i32_0 : i32, i32
  }
  func.func @transform_4(%arg0: i32) -> (i32, i32) {
    %c0_i32 = arith.constant 0 : i32
    %c0_i32_0 = arith.constant 0 : i32
    %c0_i32_1 = arith.constant 0 : i32
    return %c0_i32, %c0_i32_0 : i32, i32
  }
  func.func @transform_5(%arg0: i32) -> (i32, i32) {
    %c0_i32 = arith.constant 0 : i32
    %c0_i32_0 = arith.constant 0 : i32
    return %c0_i32, %arg0 : i32, i32
  }
}

</mosaic_0001>

<bundles_post_ra>
// kernel: simple_cnn_forward.1
= control target key start
LH: loop header
LB: loop body
LE: loop exit
PB: predicated region body
PF: predicated region fallthrough
CT: control target
= control target key end

     0   :  { %10 = vsyncpa [#allocation4], 0  ;;  %s565_s0 = inlined_call_operand.vmem [shape: f32[20,128], index: 0, kind: input, shape index: {}]   ;;  %s566_s1 = inlined_call_operand.vmem [shape: f32[8,5], index: 1, kind: input, shape index: {}]   ;;  %s567_s2 = inlined_call_operand.vmem [shape: f32[2,8], index: 2, kind: input, shape index: {}]   ;;  %s568_s3 = inlined_call_operand.vmem [shape: f32[4,64], index: 3, kind: input, shape index: {}]   ;;  %s569_s4 = inlined_call_operand.vmem [shape: f32[4,1], index: 4, kind: input, shape index: {}]   ;;  %s570_s5 = inlined_call_operand.vmem [shape: f32[4,128], index: 5, kind: output, shape index: {}]  }
   0x1   :  { %s19_s20 = sshll.u32 %s566_s1, 4  ;;  %s20_s20 = int_to_ptr.vmem [resolvable:$true] %s19_s20 }
   0x2   :  { %11 = vsyncpa [#allocation6], 0  ;;  %s28_s23 = sshll.u32 %s567_s2, 4  ;;  %s407_s24 = smov [#allocation3]   ;;  %s29_s23 = int_to_ptr.vmem [resolvable:$true] %s28_s23 }
   0x3   :  { %22 = dma.vmem_to_smem %s20_s20, 128, %s407_s24, [#allocation4]  }
   0x4   :  { %s408_s25 = smov [#allocation5]  }
   0x5   :  { %31 = dma.vmem_to_smem %s29_s23, 32, %s408_s25, [#allocation6]  }
   0x6   :  { %403 = dma.done.wait [#allocation4], 128  }
   0x7   :  { %404 = vsyncadd [#allocation4], 4294967168 }
   0x8   :  { %405 = dma.done.wait [#allocation6], 32  }
   0x9   :  { %406 = vsyncadd [#allocation6], 4294967264 }
   0xa   :  { %44 = sfence }
   0xb   :  { %s367_s26 = sld [smem:[#allocation3 + $0x380]]  ;;  %v449_v0 = vld [vmem:[%s565_s0] ss:$2 sm:$0xff]  ;;  %v454_v1 = vld [vmem:[%s565_s0 + $0x1] ss:$2 sm:$0xff]  ;;  %vm285_vm0 = vcmask 523264  }
   0xc   :  { %s368_s27 = sld [smem:[#allocation3 + $0x381]]  ;;  %v461_v2 = vld [vmem:[%s565_s0 + $0x2] ss:$2 sm:$0xff]  ;;  %v468_v4 = vld [vmem:[%s565_s0 + $0x3] ss:$2 sm:$0xff] }
   0xd   :  { %s369_s28 = sld [smem:[#allocation3 + $0x382]]  ;;  %v475_v9 = vld [vmem:[%s565_s0 + $0x4] ss:$2 sm:$0xff] }
   0xe   :  { %s370_s1 = sld [smem:[#allocation3 + $0x383]] }
   0xf   :  { %s371_s2 = sld [smem:[#allocation3 + $0x384]] }
  0x10   :  { %s456_s8 = sld [smem:[#allocation5 + $0x7]] }
  0x11   :  { %v244_v3 = vstv %s367_s26  ;;  %s463_s11 = sld [smem:[#allocation5 + $0x87]] }
  0x12   :  { %v245_v5 = vmul.f32 %v244_v3, %v449_v0  ;;  %v247_v6 = vstv %s368_s27  ;;  %s360_s14 = sld [smem:[#allocation3 + $0x300]] }
  0x13   :  { %v248_v7 = vmul.f32 %v454_v1, %v247_v6  ;;  %v251_v8 = vstv %s369_s28  ;;  %s361_s15 = sld [smem:[#allocation3 + $0x301]] }
  0x14   :  { %v252_v10 = vmul.f32 %v461_v2, %v251_v8  ;;  %v255_v11 = vstv %s370_s1  ;;  %s362_s18 = sld [smem:[#allocation3 + $0x302]] }
  0x15   :  { %v249_v12 = vadd.f32 %v248_v7, %v245_v5  ;;  %v256_v13 = vmul.f32 %v468_v4, %v255_v11  ;;  %v259_v14 = vstv %s371_s2  ;;  %s363_s19 = sld [smem:[#allocation3 + $0x303]] }
  0x16   :  { %s364_s20 = sld [smem:[#allocation3 + $0x304]]  ;;  %v260_v16 = vmul.f32 %v475_v9, %v259_v14  ;;  %v263_v21 = vstv %s456_s8 }
  0x17   :  { %v253_v15 = vadd.f32 %v252_v10, %v249_v12  ;;  %s480_s21 = sld [smem:[#allocation5 + $0x6]]  ;;  %v266_v27 = vstv %s463_s11 }
  0x18   :  { %v217_v17 = vstv %s360_s14  ;;  %s482_s0 = sld [smem:[#allocation5 + $0x86]] }
  0x19   :  { %v257_v18 = vadd.f32 %v256_v13, %v253_v15  ;;  %v218_v19 = vmul.f32 %v217_v17, %v449_v0  ;;  %v220_v20 = vstv %s361_s15  ;;  %s353_s22 = sld [smem:[#allocation3 + $0x280]] }
  0x1a   :  { %v221_v22 = vmul.f32 %v454_v1, %v220_v20  ;;  %v224_v23 = vstv %s362_s18  ;;  %s354_s23 = sld [smem:[#allocation3 + $0x281]] }
  0x1b   :  { %v261_v24 = vadd.f32 %v260_v16, %v257_v18  ;;  %v225_v25 = vmul.f32 %v461_v2, %v224_v23  ;;  %v228_v26 = vstv %s363_s19  ;;  %s355_s24 = sld [smem:[#allocation3 + $0x282]] }
  0x1c   :  { %v222_v28 = vadd.f32 %v221_v22, %v218_v19  ;;  %v229_v29 = vmul.f32 %v468_v4, %v228_v26  ;;  %v232_v30 = vstv %s364_s20  ;;  %s356_s25 = sld [smem:[#allocation3 + $0x283]] }
  0x1d   :  { %v264_v31 = vmul.f32 %v263_v21, %v261_v24  ;;  %s357_s26 = sld [smem:[#allocation3 + $0x284]]  ;;  %v233_v33 = vmul.f32 %v475_v9, %v232_v30  ;;  %v236_v40 = vstv %s480_s21 }
  0x1e   :  { %v226_v32 = vadd.f32 %v225_v25, %v222_v28  ;;  %s491_s27 = sld [smem:[#allocation5 + $0x5]]  ;;  %v239_v46 = vstv %s482_s0 }
  0x1f   :  { %v267_v34 = vadd.f32 %v266_v27, %v264_v31  ;;  %v190_v35 = vstv %s353_s22  ;;  %s493_s28 = sld [smem:[#allocation5 + $0x85]] }
  0x20   :  { %v230_v36 = vadd.f32 %v229_v29, %v226_v32  ;;  %v191_v37 = vmul.f32 %v190_v35, %v449_v0  ;;  %v193_v38 = vstv %s354_s23  ;;  %s346_s1 = sld [smem:[#allocation3 + $0x200]] }
  0x21   :  { %v268_v39 = vmax.f32 %v267_v34, 0.0  ;;  %v194_v41 = vmul.f32 %v454_v1, %v193_v38  ;;  %v197_v42 = vstv %s355_s24  ;;  %s347_s29 = sld [smem:[#allocation3 + $0x201]] }
  0x22   :  { %v234_v43 = vadd.f32 %v233_v33, %v230_v36  ;;  %v198_v44 = vmul.f32 %v461_v2, %v197_v42  ;;  %v201_v45 = vstv %s356_s25  ;;  %s348_s30 = sld [smem:[#allocation3 + $0x202]]  ;;  %v409_v42 = vmov 0  }
  0x23   :  { %297 = vmatpush.msra.mxu0 %v268_v39  ;;  %v195_v47 = vadd.f32 %v194_v41, %v191_v37  ;;  %v202_v48 = vmul.f32 %v468_v4, %v201_v45  ;;  %v205_v49 = vstv %s357_s26  ;;  %s349_s2 = sld [smem:[#allocation3 + $0x203]]  ;;  %v279_v37 = vld [vmem:[%s569_s4] sm:$0xf]  ;;  %378 = vset.pattern.permute.xlu0 %v409_v42 }
  0x24   :  { %v237_v50 = vmul.f32 %v236_v40, %v234_v43  ;;  %s350_s6 = sld [smem:[#allocation3 + $0x204]]  ;;  %v206_v52 = vmul.f32 %v475_v9, %v205_v49  ;;  %v209_v59 = vstv %s491_s27  ;;  %282 = vperm.xlu0 %378, %v279_v37  }
  0x25   :  { %v199_v51 = vadd.f32 %v198_v44, %v195_v47  ;;  %s502_s7 = sld [smem:[#allocation5 + $0x4]]  ;;  %v212_v5 = vstv %s493_s28 }
  0x26   :  { %v240_v53 = vadd.f32 %v239_v46, %v237_v50  ;;  %v163_v54 = vstv %s346_s1  ;;  %s504_s8 = sld [smem:[#allocation5 + $0x84]] }
  0x27   :  { %v203_v55 = vadd.f32 %v202_v48, %v199_v51  ;;  %v164_v56 = vmul.f32 %v163_v54, %v449_v0  ;;  %v166_v57 = vstv %s347_s29  ;;  %s339_s9 = sld [smem:[#allocation3 + $0x180]] }
  0x28   :  { %v241_v58 = vmax.f32 %v240_v53, 0.0  ;;  %v167_v60 = vmul.f32 %v454_v1, %v166_v57  ;;  %v170_v61 = vstv %s348_s30  ;;  %s340_s10 = sld [smem:[#allocation3 + $0x181]] }
  0x29   :  { %v207_v62 = vadd.f32 %v206_v52, %v203_v55  ;;  %v171_v63 = vmul.f32 %v461_v2, %v170_v61  ;;  %v174_v3 = vstv %s349_s2  ;;  %s341_s11 = sld [smem:[#allocation3 + $0x182]] }
  0x2a   :  { %298 = vmatpush.msra.mxu0 %v241_v58  ;;  %v168_v6 = vadd.f32 %v167_v60, %v164_v56  ;;  %v175_v7 = vmul.f32 %v468_v4, %v174_v3  ;;  %v178_v8 = vstv %s350_s6  ;;  %s342_s12 = sld [smem:[#allocation3 + $0x183]] }
  0x2b   :  { %v210_v10 = vmul.f32 %v209_v59, %v207_v62  ;;  %s343_s13 = sld [smem:[#allocation3 + $0x184]]  ;;  %v179_v12 = vmul.f32 %v475_v9, %v178_v8  ;;  %v182_v19 = vstv %s502_s7 }
  0x2c   :  { %v172_v11 = vadd.f32 %v171_v63, %v168_v6  ;;  %s513_s14 = sld [smem:[#allocation5 + $0x3]]  ;;  %v185_v25 = vstv %s504_s8 }
  0x2d   :  { %v213_v13 = vadd.f32 %v212_v5, %v210_v10  ;;  %v136_v14 = vstv %s339_s9  ;;  %s515_s15 = sld [smem:[#allocation5 + $0x83]] }
  0x2e   :  { %v176_v15 = vadd.f32 %v175_v7, %v172_v11  ;;  %v137_v16 = vmul.f32 %v136_v14, %v449_v0  ;;  %v139_v17 = vstv %s340_s10  ;;  %s332_s16 = sld [smem:[#allocation3 + $0x100]] }
  0x2f   :  { %v214_v18 = vmax.f32 %v213_v13, 0.0  ;;  %v140_v20 = vmul.f32 %v454_v1, %v139_v17  ;;  %v143_v21 = vstv %s341_s11  ;;  %s333_s17 = sld [smem:[#allocation3 + $0x101]] }
  0x30   :  { %v180_v22 = vadd.f32 %v179_v12, %v176_v15  ;;  %v144_v23 = vmul.f32 %v461_v2, %v143_v21  ;;  %v147_v24 = vstv %s342_s12  ;;  %s334_s18 = sld [smem:[#allocation3 + $0x102]] }
  0x31   :  { %299 = vmatpush.msra.mxu0 %v214_v18  ;;  %v141_v26 = vadd.f32 %v140_v20, %v137_v16  ;;  %v148_v27 = vmul.f32 %v468_v4, %v147_v24  ;;  %v151_v28 = vstv %s343_s13  ;;  %s335_s19 = sld [smem:[#allocation3 + $0x103]] }
  0x32   :  { %v183_v29 = vmul.f32 %v182_v19, %v180_v22  ;;  %s523_s20 = sld [smem:[#allocation3 + $0x104]]  ;;  %v152_v31 = vmul.f32 %v475_v9, %v151_v28  ;;  %v155_v39 = vstv %s513_s14 }
  0x33   :  { %v145_v30 = vadd.f32 %v144_v23, %v141_v26  ;;  %s526_s21 = sld [smem:[#allocation5 + $0x2]]  ;;  %v158_v46 = vstv %s515_s15 }
  0x34   :  { %v186_v32 = vadd.f32 %v185_v25, %v183_v29  ;;  %v109_v33 = vstv %s332_s16  ;;  %s528_s0 = sld [smem:[#allocation5 + $0x82]] }
  0x35   :  { %v149_v34 = vadd.f32 %v148_v27, %v145_v30  ;;  %v110_v35 = vmul.f32 %v109_v33, %v449_v0  ;;  %v112_v36 = vstv %s333_s17  ;;  %s325_s22 = sld [smem:[#allocation3 + $0x80]] }
  0x36   :  { %v187_v38 = vmax.f32 %v186_v32, 0.0  ;;  %v113_v40 = vmul.f32 %v454_v1, %v112_v36  ;;  %v116_v41 = vstv %s334_s18  ;;  %s326_s25 = sld [smem:[#allocation3 + $0x81]] }
  0x37   :  { %v153_v43 = vadd.f32 %v152_v31, %v149_v34  ;;  %v117_v44 = vmul.f32 %v461_v2, %v116_v41  ;;  %v120_v45 = vstv %s335_s19  ;;  %s327_s26 = sld [smem:[#allocation3 + $0x82]] }
  0x38   :  { %300 = vmatpush.msra.mxu0 %v187_v38  ;;  %v114_v47 = vadd.f32 %v113_v40, %v110_v35  ;;  %v121_v48 = vmul.f32 %v468_v4, %v120_v45  ;;  %v124_v49 = vstv %s523_s20  ;;  %s328_s4 = sld [smem:[#allocation3 + $0x83]]  ;;  %v270_v38 = vld [vmem:[%s568_s3] sm:$0xf] }
  0x39   :  { %v156_v50 = vmul.f32 %v155_v39, %v153_v43  ;;  %s329_s27 = sld [smem:[#allocation3 + $0x84]]  ;;  %v125_v52 = vmul.f32 %v475_v9, %v124_v49  ;;  %v128_v59 = vstv %s526_s21 }
  0x3a   :  { %v118_v51 = vadd.f32 %v117_v44, %v114_v47  ;;  %s541_s28 = sld [smem:[#allocation5 + $0x1]]  ;;  %v131_v5 = vstv %s528_s0 }
  0x3b   :  { %v159_v53 = vadd.f32 %v158_v46, %v156_v50  ;;  %v82_v54 = vstv %s325_s22  ;;  %s543_s1 = sld [smem:[#allocation5 + $0x81]] }
  0x3c   :  { %v122_v55 = vadd.f32 %v121_v48, %v118_v51  ;;  %v83_v56 = vmul.f32 %v82_v54, %v449_v0  ;;  %v85_v57 = vstv %s326_s25  ;;  %s54_s29 = sld [smem:[#allocation3]] }
  0x3d   :  { %v160_v58 = vmax.f32 %v159_v53, 0.0  ;;  %v86_v60 = vmul.f32 %v454_v1, %v85_v57  ;;  %v89_v61 = vstv %s327_s26  ;;  %s320_s30 = sld [smem:[#allocation3 + $0x1]] }
  0x3e   :  { %v126_v62 = vadd.f32 %v125_v52, %v122_v55  ;;  %v90_v63 = vmul.f32 %v461_v2, %v89_v61  ;;  %v93_v3 = vstv %s328_s4  ;;  %s321_s2 = sld [smem:[#allocation3 + $0x2]] }
  0x3f   :  { %301 = vmatpush.msra.mxu0 %v160_v58  ;;  %v87_v6 = vadd.f32 %v86_v60, %v83_v56  ;;  %v94_v7 = vmul.f32 %v468_v4, %v93_v3  ;;  %v97_v8 = vstv %s329_s27  ;;  %s322_s6 = sld [smem:[#allocation3 + $0x3]] }
  0x40   :  { %v129_v10 = vmul.f32 %v128_v59, %v126_v62  ;;  %s323_s7 = sld [smem:[#allocation3 + $0x4]]  ;;  %v98_v12 = vmul.f32 %v475_v9, %v97_v8  ;;  %v101_v19 = vstv %s541_s28 }
  0x41   :  { %v91_v11 = vadd.f32 %v90_v63, %v87_v6  ;;  %s73_s8 = sld [smem:[#allocation5]]  ;;  %v104_v25 = vstv %s543_s1 }
  0x42   :  { %v132_v13 = vadd.f32 %v131_v5, %v129_v10  ;;  %v55_v14 = vstv %s54_s29  ;;  %s324_s9 = sld [smem:[#allocation5 + $0x80]] }
  0x43   :  { %v95_v15 = vadd.f32 %v94_v7, %v91_v11  ;;  %v56_v16 = vmul.f32 %v55_v14, %v449_v0  ;;  %v58_v17 = vstv %s320_s30 }
  0x44   :  { %v133_v18 = vmax.f32 %v132_v13, 0.0  ;;  %v59_v20 = vmul.f32 %v454_v1, %v58_v17  ;;  %v62_v21 = vstv %s321_s2 }
  0x45   :  { %v99_v22 = vadd.f32 %v98_v12, %v95_v15  ;;  %v63_v23 = vmul.f32 %v461_v2, %v62_v21  ;;  %v66_v24 = vstv %s322_s6 }
  0x46   :  { %302 = vmatpush.msra.mxu0 %v133_v18  ;;  %v60_v26 = vadd.f32 %v59_v20, %v56_v16  ;;  %v67_v27 = vmul.f32 %v468_v4, %v66_v24  ;;  %v70_v28 = vstv %s323_s7 }
  0x47   :  { %v102_v29 = vmul.f32 %v101_v19, %v99_v22  ;;  %v71_v30 = vmul.f32 %v475_v9, %v70_v28  ;;  %v74_v1 = vstv %s73_s8 }
  0x48   :  { %v64_v0 = vadd.f32 %v63_v23, %v60_v26  ;;  %v77_v35 = vstv %s324_s9 }
  0x49   :  { %v105_v31 = vadd.f32 %v104_v25, %v102_v29 }
  0x4a   :  { %v68_v32 = vadd.f32 %v67_v27, %v64_v0 }
  0x4b   :  { %v106_v33 = vmax.f32 %v105_v31, 0.0 }
  0x4c   :  { %v72_v34 = vadd.f32 %v71_v30, %v68_v32 }
  0x4d   :  { %303 = vmatpush.msra.mxu0 %v106_v33 }
  0x4e   :  { %v75_v2 = vmul.f32 %v74_v1, %v72_v34 }
  0x50   :  { %v78_v36 = vadd.f32 %v77_v35, %v75_v2 }
  0x52   :  { %v79_v37 = vmax.f32 %v78_v36, 0.0 }
  0x54   :  { %304 = vmatpush.msra.mxu0 %v79_v37 }
  0x55   :  { %374 = vmatmul.msk.f32.vlgmr.msra.gmra.mxu0 %vm285_vm0, %v270_v38 }
  0x96   :  { %v283_v4 = vpop.permute.xlu0 %282 }
  0xd2   :  { %v306_v39 = vpop.f32.mrf.mxu0 }
  0xd3   :  { %v307_v9 = vadd.f32 %v306_v39, %v283_v4 }
  0xd5   :  { %309 = vst [vmem:[%s570_s5] sm:$0xf] %v307_v9 }
  0xd6   :  { %314 = vsyncpa [#allocation4], 1 }
  0xd7   :  { %315 = vsyncpa [#allocation6], 1 }

</bundles_post_ra>
